<compile_context>
chip_gen: v7x
topology: tpu7x:2x2x1
jax: 0.10.0
libtpu: 0.0.40
codegen_flags: <defaults>
</compile_context>

<pallas_src>
import jax
import jax.numpy as jnp
from jax.experimental import pallas as pl
from jax.experimental.pallas import tpu as pltpu

_EPS = 1e-6  # PairwiseDistance default eps (added to the difference, per PyTorch)

# Conservative double-buffer budget for the 3 streamed inputs (bytes).
# 3 inputs x 2 pipeline buffers x TILE_B * D * 4 <= _VMEM_INPUT_BUDGET.
_VMEM_INPUT_BUDGET = 24 * 1024 * 1024
_VMEM_LIMIT_BYTES = 48 * 1024 * 1024  # fits v7x's 64 MiB physical VMEM with headroom
_MAX_TILE_B = 4096


def _round_up(x, m):
    return ((x + m - 1) // m) * m


def _triplet_kernel(margin, batch, tile_b):
    def kernel(a_ref, p_ref, n_ref, out_ref):
        # Upcast once per tile; all math in f32.
        a = a_ref[...].astype(jnp.float32)
        p = p_ref[...].astype(jnp.float32)
        n = n_ref[...].astype(jnp.float32)

        # PyTorch pairwise_distance: norm(x1 - x2 + eps, p=2, dim=-1)
        dp = a - p + _EPS
        dn = a - n + _EPS
        pos = jnp.sqrt(jnp.sum(dp * dp, axis=-1, keepdims=True))  # (tile_b, 1)
        neg = jnp.sqrt(jnp.sum(dn * dn, axis=-1, keepdims=True))  # (tile_b, 1)
        hinge = jnp.maximum(margin + pos - neg, 0.0)              # (tile_b, 1)

        # Mask rows that are pure padding (B not a multiple of tile_b).
        row = (pl.program_id(0) * tile_b
               + jax.lax.broadcasted_iota(jnp.int32, (tile_b, 1), 0))
        hinge = jnp.where(row < batch, hinge, 0.0)

        # Per-tile partial sum, written as a lane-dense (1, 8, 128) tile.
        partial = jnp.sum(hinge)
        out_ref[...] = jnp.full(out_ref.shape, partial, dtype=out_ref.dtype)

    return kernel


def triplet_loss(anchor, positive, negative, margin=0.0, tile_b=None):
    """anchor/positive/negative: (B, D) arrays (f32 or bf16). Returns scalar f32 loss."""
    assert anchor.shape == positive.shape == negative.shape
    B, D = anchor.shape
    itemsize = jnp.dtype(anchor.dtype).itemsize

    # --- pick the largest batch tile that fits the double-buffer budget ---
    if tile_b is None:
        bytes_per_row = 3 * 2 * D * itemsize  # 3 inputs x 2 pipeline buffers
        tile_b = max(8, min(_VMEM_INPUT_BUDGET // bytes_per_row, _MAX_TILE_B))
        tile_b = max(8, (tile_b // 8) * 8)
        if tile_b >= B:
            tile_b = _round_up(B, 8)
    else:
        assert tile_b % 8 == 0, "tile_b must be a multiple of 8"

    padded_B = _round_up(B, tile_b)
    num_tiles = padded_B // tile_b

    if padded_B != B:
        pad = ((0, padded_B - B), (0, 0))
        anchor = jnp.pad(anchor, pad)
        positive = jnp.pad(positive, pad)
        negative = jnp.pad(negative, pad)

    in_spec = pl.BlockSpec((tile_b, D), lambda i: (i, 0))
    out_spec = pl.BlockSpec((1, 8, 128), lambda i: (i, 0, 0))

    cost = pl.CostEstimate(
        flops=8 * B * D,                 # 2 sub, 2 add-eps, 2 mul, 2 reduce-add (approx)
        transcendentals=2 * B,           # two sqrt per row
        bytes_accessed=3 * B * D * itemsize + num_tiles * 8 * 128 * 4,
    )

    partials = pl.pallas_call(
        _triplet_kernel(float(margin), B, tile_b),
        out_shape=jax.ShapeDtypeStruct((num_tiles, 8, 128), jnp.float32),
        grid=(num_tiles,),
        in_specs=[in_spec, in_spec, in_spec],
        out_specs=out_spec,
        compiler_params=pltpu.CompilerParams(
            dimension_semantics=("parallel",),
            vmem_limit_bytes=_VMEM_LIMIT_BYTES,
        ),
        cost_estimate=cost,
    )(anchor, positive, negative)

    # Tiny final reduction + mean in plain JAX (true B, not padded B).
    return jnp.sum(partials[:, 0, 0]) * (1.0 / B)


def _reference(anchor, positive, negative, margin):
    pos_d = jnp.sqrt(jnp.sum((anchor - positive + _EPS) ** 2, axis=-1))
    neg_d = jnp.sqrt(jnp.sum((anchor - negative + _EPS) ** 2, axis=-1))
    return jnp.mean(jnp.maximum(margin + pos_d - neg_d, 0.0))


if __name__ == "__main__":
    key = jax.random.PRNGKey(0)

    # --- test 1: small demo shape, margin = 0.0 (module default) ---
    k1, k2, k3, key = jax.random.split(key, 4)
    B, D = 8, 32
    anchor = jax.random.normal(k1, (B, D), dtype=jnp.float32)
    positive = jax.random.normal(k2, (B, D), dtype=jnp.float32)
    negative = jax.random.normal(k3, (B, D), dtype=jnp.float32)

    loss = triplet_loss(anchor, positive, negative, margin=0.0)
    jax.block_until_ready(loss)
    ref = _reference(anchor, positive, negative, 0.0)
    assert jnp.allclose(loss, ref, atol=1e-5, rtol=1e-5), (loss, ref)

    # --- test 2: multi-tile grid + padding mask + nonzero margin ---
    k1, k2, k3, key = jax.random.split(key, 4)
    B2, D2 = 200, 160  # B2 not a multiple of the 64-row tile -> exercises masking
    a2 = jax.random.normal(k1, (B2, D2), dtype=jnp.float32)
    p2 = jax.random.normal(k2, (B2, D2), dtype=jnp.float32)
    n2 = jax.random.normal(k3, (B2, D2), dtype=jnp.float32)

    loss2 = triplet_loss(a2, p2, n2, margin=0.2, tile_b=64)
    jax.block_until_ready(loss2)
    ref2 = _reference(a2, p2, n2, 0.2)
    assert jnp.allclose(loss2, ref2, atol=1e-5, rtol=1e-5), (loss2, ref2)

    print("KERNEL_OK")
</pallas_src>

<mosaic_0001>
module attributes {stable_mosaic.version = 11 : i64} {
  func.func @kernel(%arg0: i32, %arg1: memref<8x32xf32, #tpu.memory_space<vmem>>, %arg2: memref<8x32xf32, #tpu.memory_space<vmem>>, %arg3: memref<8x32xf32, #tpu.memory_space<vmem>>, %arg4: memref<1x8x128xf32, #tpu.memory_space<vmem>>) attributes {dimension_semantics = [#tpu.dimension_semantics<parallel>], iteration_bounds = array<i64: 1>, scalar_prefetch = 0 : i64, scratch_operands = 0 : i64, tpu.core_type = #tpu.core_type<tc>, window_params = [{transform_indices = @transform_0, window_bounds = array<i64: 8, 32>}, {transform_indices = @transform_1, window_bounds = array<i64: 8, 32>}, {transform_indices = @transform_2, window_bounds = array<i64: 8, 32>}, {transform_indices = @transform_3, window_bounds = array<i64: 1, 8, 128>}]} {
    %c0 = arith.constant 0 : index
    %c0_0 = arith.constant 0 : index
    %0 = vector.load %arg1[%c0, %c0_0] : memref<8x32xf32, #tpu.memory_space<vmem>>, vector<8x32xf32>
    %c0_1 = arith.constant 0 : index
    %c0_2 = arith.constant 0 : index
    %1 = vector.load %arg2[%c0_1, %c0_2] : memref<8x32xf32, #tpu.memory_space<vmem>>, vector<8x32xf32>
    %c0_3 = arith.constant 0 : index
    %c0_4 = arith.constant 0 : index
    %2 = vector.load %arg3[%c0_3, %c0_4] : memref<8x32xf32, #tpu.memory_space<vmem>>, vector<8x32xf32>
    %3 = arith.subf %0, %1 : vector<8x32xf32>
    %cst = arith.constant 9.99999997E-7 : f32
    %4 = vector.broadcast %cst : f32 to vector<8x32xf32>
    %5 = arith.addf %3, %4 : vector<8x32xf32>
    %6 = arith.subf %0, %2 : vector<8x32xf32>
    %cst_5 = arith.constant 9.99999997E-7 : f32
    %7 = vector.broadcast %cst_5 : f32 to vector<8x32xf32>
    %8 = arith.addf %6, %7 : vector<8x32xf32>
    %9 = arith.mulf %5, %5 : vector<8x32xf32>
    %cst_6 = arith.constant dense<0.000000e+00> : vector<8xf32>
    %10 = vector.multi_reduction <add>, %9, %cst_6 [1] : vector<8x32xf32> to vector<8xf32>
    %11 = vector.shape_cast %10 : vector<8xf32> to vector<8x1xf32>
    %12 = math.sqrt %11 : vector<8x1xf32>
    %13 = arith.mulf %8, %8 : vector<8x32xf32>
    %cst_7 = arith.constant dense<0.000000e+00> : vector<8xf32>
    %14 = vector.multi_reduction <add>, %13, %cst_7 [1] : vector<8x32xf32> to vector<8xf32>
    %15 = vector.shape_cast %14 : vector<8xf32> to vector<8x1xf32>
    %16 = math.sqrt %15 : vector<8x1xf32>
    %cst_8 = arith.constant 0.000000e+00 : f32
    %17 = vector.broadcast %cst_8 : f32 to vector<8x1xf32>
    %18 = arith.addf %17, %12 : vector<8x1xf32>
    %19 = arith.subf %18, %16 : vector<8x1xf32>
    %cst_9 = arith.constant 0.000000e+00 : f32
    %20 = vector.broadcast %cst_9 : f32 to vector<8x1xf32>
    %21 = arith.maximumf %19, %20 : vector<8x1xf32>
    %c8_i32 = arith.constant 8 : i32
    %22 = arith.muli %arg0, %c8_i32 : i32
    %23 = tpu.iota {dimensions = array<i32: 0>} : vector<8x1xi32>
    %24 = vector.broadcast %22 : i32 to vector<8x1xi32>
    %25 = arith.addi %24, %23 : vector<8x1xi32>
    %c8_i32_10 = arith.constant 8 : i32
    %26 = vector.broadcast %c8_i32_10 : i32 to vector<8x1xi32>
    %27 = arith.cmpi slt, %25, %26 : vector<8x1xi32>
    %cst_11 = arith.constant 0.000000e+00 : f32
    %28 = vector.broadcast %cst_11 : f32 to vector<8x1xf32>
    %29 = arith.select %27, %21, %28 : vector<8x1xi1>, vector<8x1xf32>
    %30 = vector.shape_cast %29 : vector<8x1xf32> to vector<1x8x1xf32>
    %cst_12 = arith.constant dense<0.000000e+00> : vector<1xf32>
    %31 = vector.multi_reduction <add>, %30, %cst_12 [1, 2] : vector<1x8x1xf32> to vector<1xf32>
    %32 = vector.shape_cast %31 : vector<1xf32> to vector<1x1x1xf32>
    %33 = vector.extract %32[0, 0, 0] : f32 from vector<1x1x1xf32>
    %34 = vector.broadcast %33 : f32 to vector<1x8x128xf32>
    %c0_13 = arith.constant 0 : index
    %c0_14 = arith.constant 0 : index
    %c0_15 = arith.constant 0 : index
    %35 = vector.load %arg4[%c0_13, %c0_14, %c0_15] : memref<1x8x128xf32, #tpu.memory_space<vmem>>, vector<1x8x128xf32>
    tpu.vector_store %arg4[%c0_13, %c0_14, %c0_15], %34 {strides = array<i32>} : memref<1x8x128xf32, #tpu.memory_space<vmem>>, vector<1x8x128xf32>,
    return
  }
  func.func @transform_0(%arg0: i32) -> (i32, i32) {
    %c0_i32 = arith.constant 0 : i32
    %c0_i32_0 = arith.constant 0 : i32
    return %arg0, %c0_i32 : i32, i32
  }
  func.func @transform_1(%arg0: i32) -> (i32, i32) {
    %c0_i32 = arith.constant 0 : i32
    %c0_i32_0 = arith.constant 0 : i32
    return %arg0, %c0_i32 : i32, i32
  }
  func.func @transform_2(%arg0: i32) -> (i32, i32) {
    %c0_i32 = arith.constant 0 : i32
    %c0_i32_0 = arith.constant 0 : i32
    return %arg0, %c0_i32 : i32, i32
  }
  func.func @transform_3(%arg0: i32) -> (i32, i32, i32) {
    %c0_i32 = arith.constant 0 : i32
    %c0_i32_0 = arith.constant 0 : i32
    %c0_i32_1 = arith.constant 0 : i32
    return %arg0, %c0_i32, %c0_i32_0 : i32, i32, i32
  }
}

</mosaic_0001>

<bundles_post_ra>
// kernel: tpu_custom_call.1
= control target key start
LH: loop header
LB: loop body
LE: loop exit
PB: predicated region body
PF: predicated region fallthrough
CT: control target
= control target key end

     0   :  { %8 = vsyncpa [#allocation3], 0  ;;  %s295_s0 = inlined_call_operand.hbm [shape: f32[8,32], index: 0, kind: input, shape index: {}]   ;;  %s296_s1 = inlined_call_operand.hbm [shape: f32[8,32], index: 1, kind: input, shape index: {}]   ;;  %s297_s2 = inlined_call_operand.hbm [shape: f32[8,32], index: 2, kind: input, shape index: {}]   ;;  %s298_s3 = inlined_call_operand.hbm [shape: f32[1,8,128], index: 3, kind: output, shape index: {}]  }
   0x1   :  { %9 = vsyncpa [#allocation6], 0 }
   0x2   :  { %10 = vsyncpa [#allocation4], 0  ;;  %s223_s12 = smov [#allocation5]   ;;  %s224_s14 = smov [#allocation2]  }
   0x3   :  { %s27_s13 = sshll.u32 %s223_s12, 4  ;;  %s17_s15 = sshll.u32 %s224_s14, 4  ;;  %s28_s13 = int_to_ptr.vmem [resolvable:$true] %s27_s13  ;;  %s18_s15 = int_to_ptr.vmem [resolvable:$true] %s17_s15 }
   0x4   :  { %s129_s18 = scalar_lea.hbm %s296_s1, 128 }
   0x5   :  { %p130_p0 = scmp.ne.s32.totalorder %s296_s1, %s129_s18  ;;  %p133_p1 = scmp.lt.u32.totalorder %s129_s18, %s296_s1 }
   0x7   :  { %p135_p2 = pnand %p133_p1, %p130_p0 }
   0x9   :  { %138 = shalt.err (!%p135_p2)
}
   0xa   :  { %s139_s23 = scalar_lea.vmem %s28_s13, 128  ;;  %p144_p4 = scmp.lt.s32.totalorder %s28_s13, %s28_s13 }
   0xb   :  { %p140_p3 = scmp.ne.s32.totalorder %s28_s13, %s139_s23  ;;  %p145_p5 = scmp.lt.s32.totalorder %s139_s23, %s139_s23 }
   0xd   :  { %p146_p6 = por %p145_p5, %p144_p4 }
   0xf   :  { %p147_p7 = pnand %p146_p6, %p140_p3 }
  0x11   :  { %150 = shalt.err (!%p147_p7)
}
  0x12   :  { %30 = dma.hbm_to_vmem [thread:$0]  %s296_s1, 128, %s28_s13, [#allocation6]  }
  0x13   :  { %s151_s28 = scalar_lea.hbm %s295_s0, 128 }
  0x14   :  { %p152_p8 = scmp.ne.s32.totalorder %s295_s0, %s151_s28  ;;  %p155_p9 = scmp.lt.u32.totalorder %s151_s28, %s295_s0 }
  0x16   :  { %p157_p10 = pnand %p155_p9, %p152_p8 }
  0x18   :  { %160 = shalt.err (!%p157_p10)
}
  0x19   :  { %s161_s6 = scalar_lea.vmem %s18_s15, 128  ;;  %p166_p12 = scmp.lt.s32.totalorder %s18_s15, %s18_s15 }
  0x1a   :  { %p162_p11 = scmp.ne.s32.totalorder %s18_s15, %s161_s6  ;;  %p167_p13 = scmp.lt.s32.totalorder %s161_s6, %s161_s6 }
  0x1c   :  { %p168_p0 = por %p167_p13, %p166_p12 }
  0x1e   :  { %p169_p1 = pnand %p168_p0, %p162_p11 }
  0x20   :  { %172 = shalt.err (!%p169_p1)
}
  0x21   :  { %20 = dma.hbm_to_vmem [thread:$0]  %s295_s0, 128, %s18_s15, [#allocation3]  }
  0x22   :  { %s225_s8 = smov [#allocation7]   ;;  %s173_s12 = scalar_lea.hbm %s297_s2, 128 }
  0x23   :  { %s37_s9 = sshll.u32 %s225_s8, 4  ;;  %p174_p2 = scmp.ne.s32.totalorder %s297_s2, %s173_s12  ;;  %s38_s9 = int_to_ptr.vmem [resolvable:$true] %s37_s9 }
  0x24   :  { %p177_p3 = scmp.lt.u32.totalorder %s173_s12, %s297_s2 }
  0x26   :  { %p179_p4 = pnand %p177_p3, %p174_p2 }
  0x28   :  { %182 = shalt.err (!%p179_p4)
}
  0x29   :  { %s183_s18 = scalar_lea.vmem %s38_s9, 128  ;;  %p188_p6 = scmp.lt.s32.totalorder %s38_s9, %s38_s9 }
  0x2a   :  { %p184_p5 = scmp.ne.s32.totalorder %s38_s9, %s183_s18  ;;  %p189_p7 = scmp.lt.s32.totalorder %s183_s18, %s183_s18 }
  0x2c   :  { %p190_p8 = por %p189_p7, %p188_p6 }
  0x2e   :  { %p191_p9 = pnand %p190_p8, %p184_p5 }
  0x30   :  { %194 = shalt.err (!%p191_p9)
}
  0x31   :  { %40 = dma.hbm_to_vmem [thread:$0]  %s297_s2, 128, %s38_s9, [#allocation6]  }
  0x32   :  { %217 = dma.done.wait [#allocation3], 128  }
  0x33   :  { %218 = vsyncadd [#allocation3], 4294967168 }
  0x34   :  { %219 = dma.done.wait [#allocation6], 256  }
  0x35   :  { %220 = vsyncadd [#allocation6], 4294967040  ;;  %v50_v0 = vld [vmem:[#allocation2] sm:$0xff]  ;;  %v51_v1 = vld [vmem:[#allocation5] sm:$0xff]  ;;  %vm58_vm0 = vcmask 261120   ;;  %vm90_vm5 = vcmask 7168  }
  0x36   :  { %v52_v2 = vld [vmem:[#allocation7] sm:$0xff]  ;;  %v53_v3 = vsub.f32 %v50_v0, %v51_v1  ;;  %s226_s2 = smov [#allocation8]  }
  0x37   :  { %v55_v4 = vsub.f32 %v50_v0, %v52_v2  ;;  %s109_s19 = sshll.u32 %s226_s2, 4  ;;  %s110_s19 = int_to_ptr.vmem [resolvable:$true] %s109_s19 }
  0x38   :  { %v54_v5 = vadd.f32 1e-06, %v53_v3  ;;  %s195_s21 = scalar_lea.vmem %s110_s19, 128  ;;  %p200_p11 = scmp.lt.s32.totalorder %s110_s19, %s110_s19 }
  0x39   :  { %v56_v6 = vadd.f32 1e-06, %v55_v4  ;;  %p196_p10 = scmp.ne.s32.totalorder %s110_s19, %s195_s21  ;;  %p201_p12 = scmp.lt.s32.totalorder %s195_s21, %s195_s21 }
  0x3a   :  { %v57_v7 = vmul.f32 %v54_v5, %v54_v5 }
  0x3b   :  { %v69_v8 = vmul.f32 %v56_v6, %v56_v6  ;;  %p202_p13 = por %p201_p12, %p200_p11 }
  0x3c   :  { %v59_v9 = vsel %vm58_vm0, %v57_v7, 0.0 }
  0x3d   :  { %60 = vadd.xlane.f32.xlu0 %v59_v9  ;;  %v70_v10 = vsel %vm58_vm0, %v69_v8, 0.0  ;;  %p203_p0 = pnand %p202_p13, %p196_p10 }
  0x41   :  { %71 = vadd.xlane.f32.xlu0 %v70_v10 }
  0xca   :  { %v61_v11 = vpop.xlane.xlu0 %60 }
  0xcb   :  { %125 = vrsqrt.f32 %v61_v11  ;;  %vm64_vm1 = vcmp.eq.f32.partialorder %v61_v11, inf  ;;  %v67_v18 = vand.u32 2147483648, %v61_v11  ;;  %vm66_vm3 = vcmp.eq.f32.partialorder %v61_v11, 0.0 }
  0xce   :  { %v72_v12 = vpop.xlane.xlu0 %71 }
  0xcf   :  { %127 = vrsqrt.f32 %v72_v12  ;;  %vm75_vm2 = vcmp.eq.f32.partialorder %v72_v12, inf  ;;  %v78_v19 = vand.u32 2147483648, %v72_v12  ;;  %vm77_vm4 = vcmp.eq.f32.partialorder %v72_v12, 0.0 }
  0xd5   :  { %v126_v13 = vpop.eup %125 }
  0xd6   :  { %v63_v14 = vmul.f32 %v126_v13, %v61_v11 }
  0xd8   :  { %v65_v17 = vsel %vm64_vm1, %v61_v11, %v63_v14 }
  0xd9   :  { %v128_v15 = vpop.eup %127  ;;  %v68_v21 = vsel %vm66_vm3, %v67_v18, %v65_v17 }
  0xda   :  { %v74_v16 = vmul.f32 %v128_v15, %v72_v12 }
  0xdc   :  { %v76_v20 = vsel %vm75_vm2, %v72_v12, %v74_v16 }
  0xdd   :  { %v79_v22 = vsel %vm77_vm4, %v78_v19, %v76_v20 }
  0xde   :  { %v81_v23 = vsub.f32 %v68_v21, %v79_v22 }
  0xe0   :  { %v82_v24 = vmax.f32 %v81_v23, 0.0 }
  0xe2   :  { %v91_v25 = vsel %vm90_vm5, %v82_v24, 0.0 }
  0xe3   :  { %92 = vadd.xlane.f32.xlu1 %v91_v25 }
 0x170   :  { %v93_v26 = vpop.xlane.xlu1 %92 }
 0x171   :  { %v94_v27 = vrot.slane %v93_v26, 4 }
 0x173   :  { %v95_v28 = vadd.f32 %v94_v27, %v93_v26 }
 0x175   :  { %v96_v29 = vrot.slane %v95_v28, 2 }
 0x177   :  { %v97_v30 = vadd.f32 %v96_v29, %v95_v28 }
 0x179   :  { %v98_v31 = vrot.slane %v97_v30, 1 }
 0x17b   :  { %v99_v32 = vadd.f32 %v98_v31, %v97_v30 }
 0x17d   :  { %119 = vpush %v99_v32 }
 0x1ae   :  { %s120_s20 = spop %119 }
 0x1af   :  { %v101_v33 = vstv %s120_s20 }
 0x1b0   :  { %102 = vst [vmem:[#allocation8] sm:$0xff] %v101_v33 }
 0x1b1   :  { %206 = shalt.err (!%p203_p0)
}
 0x1b2   :  { %s207_s24 = scalar_lea.hbm %s298_s3, 128 }
 0x1b3   :  { %p208_p1 = scmp.ne.s32.totalorder %s298_s3, %s207_s24  ;;  %p211_p2 = scmp.lt.u32.totalorder %s207_s24, %s298_s3 }
 0x1b5   :  { %p213_p3 = pnand %p211_p2, %p208_p1 }
 0x1b7   :  { %216 = shalt.err (!%p213_p3)
}
 0x1b8   :  { %112 = dma.vmem_to_hbm [thread:$0]  %s110_s19, 128, %s298_s3, [#allocation4]  }
 0x1b9   :  { %221 = dma.done.wait [#allocation4], 128  }
 0x1ba   :  { %222 = vsyncadd [#allocation4], 4294967168 }
 0x1bb   :  { %116 = vsyncpa [#allocation3], 1 }
 0x1bc   :  { %117 = vsyncpa [#allocation6], 1 }
 0x1bd   :  { %118 = vsyncpa [#allocation4], 1 }

</bundles_post_ra>
